<compile_context>
chip_gen: v7x
topology: tpu7x:2x2x1
jax: 0.10.0
libtpu: 0.0.40
codegen_flags: <defaults>
</compile_context>

<pallas_src>
import jax
import jax.numpy as jnp
from jax import lax
from jax.experimental import pallas as pl
from jax.experimental.pallas import tpu as pltpu


def _round_up(a: int, m: int) -> int:
    return ((a + m - 1) // m) * m


def mlp_kernel(x_ref, w1_ref, b1_ref, w2_ref, b2_ref, o_ref):
    # fc1 on the MXU: (TB, D) @ (D, H) -> (TB, H), accumulate in f32.
    h = jnp.dot(x_ref[...], w1_ref[...], preferred_element_type=jnp.float32)
    # Bias + ReLU in f32 on the VPU.
    h = jnp.maximum(h + b1_ref[...], 0.0)
    # fc2 as (1, H) . (TB, H)^T -> (1, TB): contraction over the last dims of
    # both operands (same dimension_numbers the q@k^T attention pattern uses).
    # The result is already lane-dense (batch on lanes), so the store is an
    # unmasked full-lane write.
    z = lax.dot_general(
        w2_ref[...], h,
        dimension_numbers=(((1,), (1,)), ((), ())),
        preferred_element_type=jnp.float32,
    )
    # Bias + sigmoid in f32; b2 is (1, 1) and broadcasts over lanes.
    o_ref[...] = jax.nn.sigmoid(z + b2_ref[...])


def mlp_forward(x, w1, b1, w2, b2, *, block_batch=1024, use_bf16=False):
    """Forward pass of MLPModel.

    x:  (B, D) f32
    w1: (D, H) f32   (fc1.weight transposed to (in, out))
    b1: (1, H) f32
    w2: (1, H) f32   (fc2.weight in PyTorch (out=1, in=H) layout)
    b2: (1, 1) f32
    returns (B, 1) f32
    """
    B, D = x.shape
    H = w1.shape[1]

    # Batch tile: multiple of 128 (lane-dense output tile), capped so that the
    # double-buffered x tile stays tiny even under v7x's 64 MiB VMEM.
    tb = max(128, min(block_batch, _round_up(B, 128)))
    Bp = _round_up(B, tb)
    if Bp != B:
        x = jnp.pad(x, ((0, Bp - B), (0, 0)))  # padded rows sliced off below

    if use_bf16:
        # bf16 MXU inputs (v6e/v7x); accumulation & activations stay f32.
        x = x.astype(jnp.bfloat16)
        w1 = w1.astype(jnp.bfloat16)

    grid = (Bp // tb,)
    out = pl.pallas_call(
        mlp_kernel,
        out_shape=jax.ShapeDtypeStruct((1, Bp), jnp.float32),
        grid_spec=pltpu.PrefetchScalarGridSpec(
            num_scalar_prefetch=0,
            grid=grid,
            in_specs=[
                pl.BlockSpec((tb, D), lambda i: (i, 0)),   # x: tiled over batch
                pl.BlockSpec((D, H), lambda i: (0, 0)),    # w1: resident
                pl.BlockSpec((1, H), lambda i: (0, 0)),    # b1: resident
                pl.BlockSpec((1, H), lambda i: (0, 0)),    # w2: resident
                pl.BlockSpec((1, 1), lambda i: (0, 0)),    # b2: resident
            ],
            out_specs=pl.BlockSpec((1, tb), lambda i: (0, i)),  # lane-dense out
        ),
        compiler_params=pltpu.CompilerParams(
            dimension_semantics=("parallel",),
        ),
    )(x, w1, b1, w2, b2)

    # Layout plumbing only: drop padding, present as (B, 1).
    return out.reshape(Bp)[:B].reshape(B, 1)


def init_params(key, input_dim, hidden_dim=32):
    """Deterministic init mirroring nn.Linear shapes."""
    k1, k2, k3, k4 = jax.random.split(key, 4)
    bound1 = 1.0 / (input_dim ** 0.5)
    bound2 = 1.0 / (hidden_dim ** 0.5)
    # fc1.weight is (out, in) in PyTorch; stored here as (in, out) for the MXU.
    w1 = jax.random.uniform(k1, (input_dim, hidden_dim), jnp.float32, -bound1, bound1)
    b1 = jax.random.uniform(k2, (1, hidden_dim), jnp.float32, -bound1, bound1)
    # fc2.weight is (1, hidden) in PyTorch; kept in that layout.
    w2 = jax.random.uniform(k3, (1, hidden_dim), jnp.float32, -bound2, bound2)
    b2 = jax.random.uniform(k4, (1, 1), jnp.float32, -bound2, bound2)
    return w1, b1, w2, b2


def _reference(x, w1, b1, w2, b2):
    h = jnp.maximum(x @ w1 + b1, 0.0)
    return jax.nn.sigmoid(h @ w2.T + b2)


if __name__ == "__main__":
    key = jax.random.PRNGKey(0)
    kx, kx2, kp = jax.random.split(key, 3)

    D, H = 16, 32
    w1, b1, w2, b2 = init_params(kp, D, H)

    # Small case (single tile, batch padded 8 -> 128).
    B = 8
    x = jax.random.normal(kx, (B, D), jnp.float32)
    out = jax.block_until_ready(mlp_forward(x, w1, b1, w2, b2))
    ref = _reference(x, w1, b1, w2, b2)
    assert out.shape == (B, 1)
    assert jnp.allclose(out, ref, atol=1e-5, rtol=1e-5)

    # Multi-tile case (grid of 3, non-multiple batch padded 300 -> 384).
    B2 = 300
    x2 = jax.random.normal(kx2, (B2, D), jnp.float32)
    out2 = jax.block_until_ready(mlp_forward(x2, w1, b1, w2, b2, block_batch=128))
    ref2 = _reference(x2, w1, b1, w2, b2)
    assert out2.shape == (B2, 1)
    assert jnp.allclose(out2, ref2, atol=1e-5, rtol=1e-5)

    print("KERNEL_OK")
</pallas_src>

<mosaic_0001>
module attributes {stable_mosaic.version = 11 : i64} {
  func.func @mlp_kernel(%arg0: i32, %arg1: memref<128x16xf32, #tpu.memory_space<vmem>>, %arg2: memref<16x32xf32, #tpu.memory_space<vmem>>, %arg3: memref<1x32xf32, #tpu.memory_space<vmem>>, %arg4: memref<1x32xf32, #tpu.memory_space<vmem>>, %arg5: memref<1x1xf32, #tpu.memory_space<vmem>>, %arg6: memref<1x128xf32, #tpu.memory_space<vmem>>) attributes {dimension_semantics = [#tpu.dimension_semantics<parallel>], iteration_bounds = array<i64: 1>, scalar_prefetch = 0 : i64, scratch_operands = 0 : i64, tpu.core_type = #tpu.core_type<tc>, window_params = [{transform_indices = @transform_0, window_bounds = array<i64: 128, 16>}, {pipeline_mode = #tpu.pipeline_mode<synchronous>, transform_indices = @transform_1, window_bounds = array<i64: 16, 32>}, {pipeline_mode = #tpu.pipeline_mode<synchronous>, transform_indices = @transform_2, window_bounds = array<i64: 1, 32>}, {pipeline_mode = #tpu.pipeline_mode<synchronous>, transform_indices = @transform_3, window_bounds = array<i64: 1, 32>}, {pipeline_mode = #tpu.pipeline_mode<synchronous>, transform_indices = @transform_4, window_bounds = array<i64: 1, 1>}, {transform_indices = @transform_5, window_bounds = array<i64: 1, 128>}]} {
    %c0 = arith.constant 0 : index
    %c0_0 = arith.constant 0 : index
    %0 = vector.load %arg1[%c0, %c0_0] : memref<128x16xf32, #tpu.memory_space<vmem>>, vector<128x16xf32>
    %c0_1 = arith.constant 0 : index
    %c0_2 = arith.constant 0 : index
    %1 = vector.load %arg2[%c0_1, %c0_2] : memref<16x32xf32, #tpu.memory_space<vmem>>, vector<16x32xf32>
    %cst = arith.constant dense<0.000000e+00> : vector<128x32xf32>
    %2 = tpu.matmul %0, %1, %cst {dimension_numbers = #tpu.dot_dimension_numbers<[1], [0], [0], [1], [0, 0, 1, 1], [], []>} : vector<128x16xf32>, vector<16x32xf32>, vector<128x32xf32> -> vector<128x32xf32>
    %c0_3 = arith.constant 0 : index
    %c0_4 = arith.constant 0 : index
    %3 = vector.load %arg3[%c0_3, %c0_4] : memref<1x32xf32, #tpu.memory_space<vmem>>, vector<1x32xf32>
    %4 = vector.broadcast %3 : vector<1x32xf32> to vector<128x32xf32>
    %5 = arith.addf %2, %4 : vector<128x32xf32>
    %cst_5 = arith.constant 0.000000e+00 : f32
    %6 = vector.broadcast %cst_5 : f32 to vector<128x32xf32>
    %7 = arith.maximumf %5, %6 : vector<128x32xf32>
    %c0_6 = arith.constant 0 : index
    %c0_7 = arith.constant 0 : index
    %8 = vector.load %arg4[%c0_6, %c0_7] : memref<1x32xf32, #tpu.memory_space<vmem>>, vector<1x32xf32>
    %cst_8 = arith.constant dense<0.000000e+00> : vector<1x128xf32>
    %9 = tpu.matmul %8, %7, %cst_8 {dimension_numbers = #tpu.dot_dimension_numbers<[1], [1], [0], [0], [0, 0, 1, 0], [], []>} : vector<1x32xf32>, vector<128x32xf32>, vector<1x128xf32> -> vector<1x128xf32>
    %c0_9 = arith.constant 0 : index
    %c0_10 = arith.constant 0 : index
    %10 = vector.load %arg5[%c0_9, %c0_10] : memref<1x1xf32, #tpu.memory_space<vmem>>, vector<1x1xf32>
    %11 = vector.broadcast %10 : vector<1x1xf32> to vector<1x128xf32>
    %12 = arith.addf %9, %11 : vector<1x128xf32>
    %13 = arith.negf %12 : vector<1x128xf32>
    %14 = math.exp %13 : vector<1x128xf32>
    %cst_11 = arith.constant 1.000000e+00 : f32
    %15 = vector.broadcast %cst_11 : f32 to vector<1x128xf32>
    %16 = arith.addf %15, %14 : vector<1x128xf32>
    %17 = arith.divf %15, %16 : vector<1x128xf32>
    %c0_12 = arith.constant 0 : index
    %c0_13 = arith.constant 0 : index
    %18 = vector.load %arg6[%c0_12, %c0_13] : memref<1x128xf32, #tpu.memory_space<vmem>>, vector<1x128xf32>
    tpu.vector_store %arg6[%c0_12, %c0_13], %17 {strides = array<i32>} : memref<1x128xf32, #tpu.memory_space<vmem>>, vector<1x128xf32>,
    return
  }
  func.func @transform_0(%arg0: i32) -> (i32, i32) {
    %c0_i32 = arith.constant 0 : i32
    %c0_i32_0 = arith.constant 0 : i32
    return %arg0, %c0_i32 : i32, i32
  }
  func.func @transform_1(%arg0: i32) -> (i32, i32) {
    %c0_i32 = arith.constant 0 : i32
    %c0_i32_0 = arith.constant 0 : i32
    %c0_i32_1 = arith.constant 0 : i32
    return %c0_i32, %c0_i32_0 : i32, i32
  }
  func.func @transform_2(%arg0: i32) -> (i32, i32) {
    %c0_i32 = arith.constant 0 : i32
    %c0_i32_0 = arith.constant 0 : i32
    %c0_i32_1 = arith.constant 0 : i32
    return %c0_i32, %c0_i32_0 : i32, i32
  }
  func.func @transform_3(%arg0: i32) -> (i32, i32) {
    %c0_i32 = arith.constant 0 : i32
    %c0_i32_0 = arith.constant 0 : i32
    %c0_i32_1 = arith.constant 0 : i32
    return %c0_i32, %c0_i32_0 : i32, i32
  }
  func.func @transform_4(%arg0: i32) -> (i32, i32) {
    %c0_i32 = arith.constant 0 : i32
    %c0_i32_0 = arith.constant 0 : i32
    %c0_i32_1 = arith.constant 0 : i32
    return %c0_i32, %c0_i32_0 : i32, i32
  }
  func.func @transform_5(%arg0: i32) -> (i32, i32) {
    %c0_i32 = arith.constant 0 : i32
    %c0_i32_0 = arith.constant 0 : i32
    return %c0_i32, %arg0 : i32, i32
  }
}

</mosaic_0001>

<bundles_post_ra>
// kernel: tpu_custom_call.1
= control target key start
LH: loop header
LB: loop body
LE: loop exit
PB: predicated region body
PF: predicated region fallthrough
CT: control target
= control target key end

     0   :  { %s772_s0 = inlined_call_operand.vmem [shape: f32[128,16], index: 0, kind: input, shape index: {}]   ;;  %s773_s1 = inlined_call_operand.vmem [shape: f32[16,32], index: 1, kind: input, shape index: {}]   ;;  %s774_s2 = inlined_call_operand.vmem [shape: f32[1,32], index: 2, kind: input, shape index: {}]   ;;  %s775_s3 = inlined_call_operand.vmem [shape: f32[1,32], index: 3, kind: input, shape index: {}]   ;;  %s776_s4 = inlined_call_operand.<no memory space> [shape: f32[1,1], index: 4, kind: input, shape index: {}]   ;;  %s777_s5 = inlined_call_operand.hbm [shape: f32[1,128], index: 5, kind: output, shape index: {}]  }
   0x1   :  { %v10_v0 = vstv %s776_s4 }
   0x2   :  { %11 = vst [vmem:[#allocation2] sm:$0x1] %v10_v0 }
   0x3   :  { %v39_v1 = vld [vmem:[%s773_s1] sm:$0xff]  ;;  %v40_v2 = vld [vmem:[%s773_s1 + $0x8] sm:$0xff]  ;;  %vm48_vm0 = vcmask 130048   ;;  %v25_v6 = vld [vmem:[%s772_s0 + $0x10] sm:$0xff] }
   0x4   :  { %v23_v3 = vld [vmem:[%s772_s0] sm:$0xff]  ;;  %v545_v4 = vpack.c.bf16 %v40_v2, %v39_v1  ;;  %v24_v5 = vld [vmem:[%s772_s0 + $0x8] sm:$0xff] }
   0x5   :  { %486 = vmatprep.mubr.msk.f32.mxu0 %vm48_vm0, %v23_v3 }
   0x6   :  { %546 = vmatprep.subr.bf16.mxu0 %v545_v4 }
   0x7   :  { %548 = vmatpush3.bf16.msra.mxu0 %v545_v4 }
   0x8   :  { %12 = vsyncpa [#allocation4], 0  ;;  %v26_v7 = vld [vmem:[%s772_s0 + $0x18] sm:$0xff]  ;;  %v27_v8 = vld [vmem:[%s772_s0 + $0x20] sm:$0xff]  ;;  %v615_v20 = vmov 0.0|0.0   ;;  %vm616_vm1 = vmmov 0  }
   0x9   :  { %v28_v9 = vld [vmem:[%s772_s0 + $0x28] sm:$0xff]  ;;  %v29_v10 = vld [vmem:[%s772_s0 + $0x30] sm:$0xff]  ;;  %v30_v11 = vld [vmem:[%s772_s0 + $0x38] sm:$0xff]  ;;  %549 = vmatprep.subr.bf16.mxu1 %v615_v20  ;;  %v617_v21 = vmov 0.0   ;;  %v618_v23 = vmov 0   ;;  %vm269_vm2 = vcmask 261120  }
   0xa   :  { %487 = vmatmul.mubr.msk.f32.vlgmr.msra.gmra.mrb[0].mxu0 %vm48_vm0, %v24_v5  ;;  %v31_v12 = vld [vmem:[%s772_s0 + $0x40] sm:$0xff]  ;;  %v32_v13 = vld [vmem:[%s772_s0 + $0x48] sm:$0xff]  ;;  %v33_v14 = vld [vmem:[%s772_s0 + $0x50] sm:$0xff]  ;;  %542 = vmatprep.mubr.msk.f32.mxu1 %vm616_vm1, %v617_v21  ;;  %s619_s29 = smov [#allocation3]  }
   0xb   :  { %489 = vmatprep.mubr.msk.f32.mxu0 %vm48_vm0, %v25_v6  ;;  %v34_v15 = vld [vmem:[%s772_s0 + $0x58] sm:$0xff]  ;;  %v35_v16 = vld [vmem:[%s772_s0 + $0x60] sm:$0xff]  ;;  %v36_v17 = vld [vmem:[%s772_s0 + $0x68] sm:$0xff]  ;;  %586 = vset.pattern.permute.xlu0 %v618_v23  ;;  %s404_s30 = sshll.u32 %s619_s29, 4  ;;  %s405_s30 = int_to_ptr.vmem [resolvable:$true] %s404_s30 }
   0xc   :  { %v37_v18 = vld [vmem:[%s772_s0 + $0x70] sm:$0xff]  ;;  %v38_v19 = vld [vmem:[%s772_s0 + $0x78] sm:$0xff]  ;;  %v259_v22 = vld [vmem:[#allocation2] sm:$0x1]  ;;  %s595_s6 = scalar_lea.vmem %s405_s30, 32  ;;  %p596_p1 = scmp.lt.s32.totalorder %s405_s30, %s405_s30 }
   0xd   :  { %262 = vperm.xlu0 %586, %v259_v22   ;;  %v412_v24 = vld [vmem:[%s774_s2] ss:$0 sm:$0xff]  ;;  %vm729_vm3 = vmpackc.low %vm269_vm2, %vm269_vm2 }
   0xe   :  { %490 = vmatmul.mubr.msk.f32.gmra.mrb[2].mxu0 %vm48_vm0, %v26_v7 }
   0xf   :  { %492 = vmatprep.mubr.msk.f32.mxu0 %vm48_vm0, %v27_v8 }
  0x12   :  { %493 = vmatmul.mubr.msk.f32.gmra.mrb[4].mxu0 %vm48_vm0, %v28_v9 }
  0x13   :  { %495 = vmatprep.mubr.msk.f32.mxu0 %vm48_vm0, %v29_v10 }
  0x16   :  { %496 = vmatmul.mubr.msk.f32.gmra.mrb[6].mxu0 %vm48_vm0, %v30_v11 }
  0x17   :  { %498 = vmatprep.mubr.msk.f32.mxu0 %vm48_vm0, %v31_v12 }
  0x1a   :  { %499 = vmatmul.mubr.msk.f32.gmra.mrb[8].mxu0 %vm48_vm0, %v32_v13 }
  0x1b   :  { %501 = vmatprep.mubr.msk.f32.mxu0 %vm48_vm0, %v33_v14 }
  0x1e   :  { %502 = vmatmul.mubr.msk.f32.gmra.mrb[10].mxu0 %vm48_vm0, %v34_v15 }
  0x1f   :  { %504 = vmatprep.mubr.msk.f32.mxu0 %vm48_vm0, %v35_v16 }
  0x22   :  { %505 = vmatmul.mubr.msk.f32.gmra.mrb[12].mxu0 %vm48_vm0, %v36_v17 }
  0x23   :  { %507 = vmatprep.mubr.msk.f32.mxu0 %vm48_vm0, %v37_v18  ;;  %v258_v18 = vld [vmem:[%s775_s3] sm:$0x1]  ;;  %s591_s3 = scalar_lea.vmem %s405_s30, 16 }
  0x24   :  { %p592_p0 = scmp.ne.s32.totalorder %s405_s30, %s591_s3  ;;  %p597_p2 = scmp.lt.s32.totalorder %s595_s6, %s591_s3 }
  0x26   :  { %508 = vmatmul.mubr.msk.f32.gmra.mrb[14].mxu0 %vm48_vm0, %v38_v19  ;;  %v265_v19 = vlaneseq  ;;  %p598_p3 = por %p597_p2, %p596_p1 }
  0x28   :  { %v266_v21 = vshrl.u32 %v265_v19, 7  ;;  %p599_p4 = pnand %p598_p3, %p592_p0 }
  0x2a   :  { %v267_v22 = vsub.s32 0, %v266_v21 }
  0x8c   :  { %v263_v23 = vpop.permute.xlu0 %262 }
  0xdd   :  { %v488_v25 = vpop.f32.mrb[0].mxu0 }
  0xde   :  { %v169_v26 = vadd.f32 %v488_v25, %v412_v24  ;;  %v163_v27 = vpop.f32.mrb[1].mxu0 }
  0xdf   :  { %v164_v28 = vadd.f32 %v412_v24, %v163_v27 }
  0xe0   :  { %v243_v29 = vmax.f32 %v169_v26, 0.0 }
  0xe1   :  { %v242_v30 = vmax.f32 %v164_v28, 0.0  ;;  %v491_v31 = vpop.f32.mrb[2].mxu0 }
  0xe2   :  { %v179_v32 = vadd.f32 %v491_v31, %v412_v24  ;;  %v173_v33 = vpop.f32.mrb[3].mxu0 }
  0xe3   :  { %v550_v35 = vpack.c.bf16 %v243_v29, %v242_v30  ;;  %v174_v36 = vadd.f32 %v412_v24, %v173_v33 }
  0xe4   :  { %v245_v37 = vmax.f32 %v179_v32, 0.0 }
  0xe5   :  { %v244_v38 = vmax.f32 %v174_v36, 0.0  ;;  %552 = vmatpush3.bf16.xpose.msk.msra.mxu1 %vm729_vm3, %v550_v35  ;;  %v494_v39 = vpop.f32.mrb[4].mxu0 }
  0xe6   :  { %v189_v40 = vadd.f32 %v494_v39, %v412_v24  ;;  %553 = vmatprep.subr.bf16.mxu1 %v615_v20  ;;  %v183_v41 = vpop.f32.mrb[5].mxu0 }
  0xe7   :  { %v554_v42 = vpack.c.bf16 %v245_v37, %v244_v38  ;;  %v184_v43 = vadd.f32 %v412_v24, %v183_v41 }
  0xe8   :  { %v247_v44 = vmax.f32 %v189_v40, 0.0 }
  0xe9   :  { %v246_v45 = vmax.f32 %v184_v43, 0.0  ;;  %v497_v46 = vpop.f32.mrb[6].mxu0 }
  0xea   :  { %v199_v47 = vadd.f32 %v497_v46, %v412_v24  ;;  %v193_v48 = vpop.f32.mrb[7].mxu0 }
  0xeb   :  { %v558_v49 = vpack.c.bf16 %v247_v44, %v246_v45  ;;  %v194_v50 = vadd.f32 %v412_v24, %v193_v48 }
  0xec   :  { %v249_v51 = vmax.f32 %v199_v47, 0.0 }
  0xed   :  { %556 = vmatpush3.bf16.xpose.msk.msra.mxu1 %vm729_vm3, %v554_v42  ;;  %v248_v52 = vmax.f32 %v194_v50, 0.0  ;;  %v500_v53 = vpop.f32.mrb[8].mxu0 }
  0xee   :  { %557 = vmatprep.subr.bf16.mxu1 %v615_v20  ;;  %v209_v54 = vadd.f32 %v500_v53, %v412_v24  ;;  %v203_v55 = vpop.f32.mrb[9].mxu0 }
  0xef   :  { %v562_v56 = vpack.c.bf16 %v249_v51, %v248_v52  ;;  %v204_v57 = vadd.f32 %v412_v24, %v203_v55 }
  0xf0   :  { %v251_v58 = vmax.f32 %v209_v54, 0.0 }
  0xf1   :  { %v250_v59 = vmax.f32 %v204_v57, 0.0  ;;  %v503_v60 = vpop.f32.mrb[10].mxu0 }
  0xf2   :  { %v219_v61 = vadd.f32 %v503_v60, %v412_v24  ;;  %v213_v62 = vpop.f32.mrb[11].mxu0 }
  0xf3   :  { %v566_v63 = vpack.c.bf16 %v251_v58, %v250_v59  ;;  %v214_v0 = vadd.f32 %v412_v24, %v213_v62 }
  0xf4   :  { %v253_v1 = vmax.f32 %v219_v61, 0.0 }
  0xf5   :  { %560 = vmatpush3.bf16.xpose.msk.msra.mxu1 %vm729_vm3, %v558_v49  ;;  %v252_v2 = vmax.f32 %v214_v0, 0.0  ;;  %v506_v3 = vpop.f32.mrb[12].mxu0 }
  0xf6   :  { %561 = vmatprep.subr.bf16.mxu1 %v615_v20  ;;  %v229_v4 = vadd.f32 %v506_v3, %v412_v24  ;;  %v223_v5 = vpop.f32.mrb[13].mxu0 }
  0xf7   :  { %v570_v6 = vpack.c.bf16 %v253_v1, %v252_v2  ;;  %v224_v7 = vadd.f32 %v412_v24, %v223_v5 }
  0xf8   :  { %v255_v8 = vmax.f32 %v229_v4, 0.0 }
  0xf9   :  { %v254_v9 = vmax.f32 %v224_v7, 0.0  ;;  %v509_v10 = vpop.f32.mrb[14].mxu0 }
  0xfa   :  { %v239_v11 = vadd.f32 %v509_v10, %v412_v24  ;;  %v233_v12 = vpop.f32.mrb[15].mxu0 }
  0xfb   :  { %v574_v13 = vpack.c.bf16 %v255_v8, %v254_v9  ;;  %v234_v14 = vadd.f32 %v412_v24, %v233_v12  ;;  %v268_v24 = vrot.slane %v263_v23, %v267_v22 }
  0xfc   :  { %v257_v15 = vmax.f32 %v239_v11, 0.0 }
  0xfd   :  { %564 = vmatpush3.bf16.xpose.msk.msra.mxu1 %vm729_vm3, %v562_v56  ;;  %v256_v16 = vmax.f32 %v234_v14, 0.0 }
  0xfe   :  { %565 = vmatprep.subr.bf16.mxu1 %v615_v20 }
  0xff   :  { %v578_v17 = vpack.c.bf16 %v257_v15, %v256_v16 }
 0x105   :  { %568 = vmatpush3.bf16.xpose.msk.msra.mxu1 %vm729_vm3, %v566_v63 }
 0x106   :  { %569 = vmatprep.subr.bf16.mxu1 %v615_v20 }
 0x10d   :  { %572 = vmatpush3.bf16.xpose.msk.msra.mxu1 %vm729_vm3, %v570_v6 }
 0x10e   :  { %573 = vmatprep.subr.bf16.mxu1 %v615_v20 }
 0x115   :  { %576 = vmatpush3.bf16.xpose.msk.msra.mxu1 %vm729_vm3, %v574_v13 }
 0x116   :  { %577 = vmatprep.subr.bf16.mxu1 %v615_v20 }
 0x11d   :  { %580 = vmatpush3.bf16.xpose.msk.msra.mxu1 %vm729_vm3, %v578_v17 }
 0x124   :  { %543 = vmatmul.mubr.msk.f32.vlgmr.msra.gmra.mrb[0].mxu1 %vm269_vm2, %v258_v18 }
 0x1f7   :  { %v387_v25 = vpop.f32.mrb[0].mxu1 }
 0x1f8   :  { %v388_v26 = vadd.f32 %v387_v25, %v268_v24  ;;  %v544_v27 = vpop.f32.mrb[1].mxu1 }
 0x1fa   :  { %v446_v28 = vmul.f32 -1.442695, %v388_v26 }
 0x1fc   :  { %587 = vpow2.f32 %v446_v28 }
 0x206   :  { %v588_v20 = vpop.eup %587 }
 0x207   :  { %v394_v29 = vadd.f32 1.0, %v588_v20 }
 0x209   :  { %589 = vrcp.f32 %v394_v29 }
 0x213   :  { %v590_v30 = vpop.eup %589 }
 0x214   :  { %397 = vst [vmem:[#allocation3] sm:$0x1] %v590_v30 }
 0x215   :  { %602 = shalt.err (!%p599_p4)
}
 0x216   :  { %s603_s9 = scalar_lea.hbm %s777_s5, 16 }
 0x217   :  { %p604_p5 = scmp.ne.s32.totalorder %s777_s5, %s603_s9  ;;  %p607_p6 = scmp.lt.u32.totalorder %s603_s9, %s777_s5 }
 0x219   :  { %p609_p7 = pnand %p607_p6, %p604_p5 }
 0x21b   :  { %612 = shalt.err (!%p609_p7)
}
 0x21c   :  { %407 = dma.vmem_to_hbm [thread:$0]  %s405_s30, 16, %s777_s5, [#allocation4]  }
 0x21d   :  { %613 = dma.done.wait [#allocation4], 16  }
 0x21e   :  { %614 = vsyncadd [#allocation4], 4294967280 }
 0x21f   :  { %411 = vsyncpa [#allocation4], 1 }

</bundles_post_ra>
